<compile_context>
chip_gen: v5e
topology: v5e:2x2
jax: 0.10.0
libtpu: 0.0.40
codegen_flags: <defaults>
</compile_context>

<pallas_src>
import jax
import jax.numpy as jnp
from jax import lax
from jax.experimental import pallas as pl
from jax.experimental.pallas import tpu as pltpu


# --------------------------------------------------------------------------- #
# helpers
# --------------------------------------------------------------------------- #
def _round_up(x, m):
    return ((x + m - 1) // m) * m


def _cdiv(a, b):
    return -(-a // b)


def _sublane_multiple(dtype):
    # f32 -> 8, bf16 -> 16, int8/fp8 -> 32 (sublane packing of a vreg).
    return max(8, 32 // jnp.dtype(dtype).itemsize)


def _vmem_capacity_bytes():
    try:
        return int(pltpu.get_tpu_info().vmem_capacity_bytes)
    except Exception:
        return 64 * 1024 * 1024  # conservative default = v7x per-TC VMEM


# --------------------------------------------------------------------------- #
# kernels  (all outputs are the transposed, lane-dense tile [nbands, block_b])
# --------------------------------------------------------------------------- #
def _dot2d_fast_kernel(spectra_ref, trans_ref, inv_ref, out_ref):
    # trans_ref: [L, S]  spectra_ref: [TB, S]  -> MXU emits [L, TB] (lane-dense)
    dp = lax.dot_general(
        trans_ref[...], spectra_ref[...],
        dimension_numbers=(((1,), (1,)), ((), ())),
        preferred_element_type=jnp.float32)
    out_ref[...] = (dp * inv_ref[...]).astype(out_ref.dtype)


def _dot2d_reduce_kernel(spectra_ref, trans_ref, inv_ref, out_ref, acc_ref):
    s_idx = pl.program_id(1)

    @pl.when(s_idx == 0)
    def _():
        acc_ref[...] = jnp.zeros_like(acc_ref)

    acc_ref[...] += lax.dot_general(
        trans_ref[...], spectra_ref[...],
        dimension_numbers=(((1,), (1,)), ((), ())),
        preferred_element_type=jnp.float32)

    @pl.when(s_idx == pl.num_programs(1) - 1)
    def _():
        out_ref[...] = (acc_ref[...] * inv_ref[...]).astype(out_ref.dtype)


def _dot3d_fast_kernel(spectra_ref, trans_ref, inv_ref, out_ref):
    # spectra: [TB, S]  trans: [TB, L, S] -> out [L, TB]
    sp = spectra_ref[...].astype(jnp.float32)
    tr = trans_ref[...].astype(jnp.float32)
    dp = jnp.sum(tr * sp[:, None, :], axis=-1)            # [TB, L] (one XLU reduce)
    out_ref[...] = (dp.T * inv_ref[...]).astype(out_ref.dtype)


def _dot3d_reduce_kernel(spectra_ref, trans_ref, inv_ref, out_ref, acc_ref):
    # acc_ref: [TB, L, 128] f32 lane-partial sums (VPU-only inner loop; the
    # XLU lane reduce is hoisted to the finalize step).
    s_idx = pl.program_id(1)

    @pl.when(s_idx == 0)
    def _():
        acc_ref[...] = jnp.zeros_like(acc_ref)

    sp = spectra_ref[...]                                  # [TB, Sb]
    tr = trans_ref[...]                                    # [TB, L, Sb]
    block_s = tr.shape[-1]                                 # multiple of 128 by construction
    partial = acc_ref[...]
    for c in range(block_s // 128):
        lo = c * 128
        spc = sp[:, lo:lo + 128].astype(jnp.float32)       # [TB, 128]
        trc = tr[:, :, lo:lo + 128].astype(jnp.float32)    # [TB, L, 128]
        partial = partial + trc * spc[:, None, :]
    acc_ref[...] = partial

    @pl.when(s_idx == pl.num_programs(1) - 1)
    def _():
        dp = jnp.sum(acc_ref[...], axis=-1)                # [TB, L]
        out_ref[...] = (dp.T * inv_ref[...]).astype(out_ref.dtype)


# --------------------------------------------------------------------------- #
# wrapper
# --------------------------------------------------------------------------- #
def hs_integrate(
    spectra,
    trans,
    trans_mask,
    nsmpl,
    *,
    integration_method="dot_prod",
    block_s_max=2048,
    single_s_tile=None,          # None = auto, True/False = force fast / reduce path
    vmem_budget_bytes=None,
    interpret=False,
):
    """JAX/Pallas equivalent of HyperSpectralIntegrator.forward (dot_prod paths)."""
    del trans_mask  # unused by every dot_prod_* branch of the reference

    if integration_method == "identity":
        return spectra

    spectra = jnp.asarray(spectra)
    trans = jnp.asarray(trans)
    if trans.ndim not in (2, 3):
        raise ValueError("wrong dimension of transmission when doing integration")

    bsz, S = spectra.shape
    nbands = trans.shape[-2]
    trans_ndim = trans.ndim
    out_dtype = jnp.result_type(spectra.dtype, trans.dtype)

    # --- reciprocal of nsmpl, oriented lane-dense ([nbands, ...]) -------------
    inv = 1.0 / jnp.asarray(nsmpl, dtype=jnp.float32)
    if inv.ndim == 0:
        inv = inv.reshape(1, 1)
    elif inv.ndim == 1:
        if inv.shape[0] == 1:
            inv = inv.reshape(1, 1)
        elif inv.shape[0] == nbands:        # per-band (infer)
            inv = inv.reshape(1, nbands)
        elif inv.shape[0] == bsz:           # per-pixel
            inv = inv.reshape(bsz, 1)
        else:
            raise ValueError("nsmpl shape not understood")
    elif inv.ndim != 2:
        raise ValueError("nsmpl must be at most 2-D")
    batch_indep = inv.shape[0] == 1
    if batch_indep:
        inv_t = jnp.broadcast_to(inv, (1, nbands)).T        # [nbands, 1]
    else:
        if inv.shape[0] != bsz:
            raise ValueError("per-pixel nsmpl must have leading dim bsz")
        inv_t = jnp.broadcast_to(inv, (bsz, nbands)).T      # [nbands, bsz]

    # --- VMEM budget ----------------------------------------------------------
    sp_item = jnp.dtype(spectra.dtype).itemsize
    tr_item = jnp.dtype(trans.dtype).itemsize
    out_item = jnp.dtype(out_dtype).itemsize
    nb_pad_tr = _round_up(nbands, _sublane_multiple(trans.dtype))
    nb_pad_f32 = _round_up(nbands, 8)

    vmem_cap = _vmem_capacity_bytes()
    vmem_limit = max(24 * 1024 * 1024, min(int(0.72 * vmem_cap), 100 * 1024 * 1024))
    budget = int(vmem_budget_bytes) if vmem_budget_bytes is not None else (2 * vmem_limit) // 3

    def _bytes_needed(bs, bb):
        """Rough per-grid-step VMEM working set (includes double buffering)."""
        n = 2 * bb * bs * sp_item                           # spectra blocks
        n += 2 * nb_pad_f32 * bb * out_item                 # output blocks
        if trans_ndim == 2:
            n += 2 * nb_pad_tr * bs * tr_item               # trans blocks
            n += 2 * nb_pad_f32 * bb * 4                    # f32 acc + MXU result
        else:
            n += 2 * bb * nb_pad_tr * bs * tr_item          # trans blocks (dominant)
            inter = 1 if tr_item >= 4 else 2                # f32 cast+product live set
            n += inter * bb * nb_pad_f32 * bs * 4
            n += 3 * bb * nb_pad_f32 * 128 * 4              # lane-partial acc + chunk temps
        return n

    # --- sample-axis tiling ---------------------------------------------------
    min_bb_check = max(8, min(bsz, 128))
    can_collapse = _bytes_needed(S, min_bb_check) <= budget
    if single_s_tile is None:
        collapse = can_collapse
    elif single_s_tile:
        if not can_collapse:
            raise ValueError("single_s_tile requested but the full-S tile exceeds the VMEM budget")
        collapse = True
    else:
        collapse = False

    pad_s = 0
    if collapse:
        block_s = S
        grid_s = 1
    else:
        cap = max(128, (min(block_s_max, S) // 128) * 128)
        while cap > 128 and _bytes_needed(cap, min(bsz, 128)) > budget:
            cap = max(128, ((cap // 2) // 128) * 128)
        block_s = 0
        d = cap
        while d >= 128:
            if S % d == 0:
                block_s = d
                break
            d -= 128
        if block_s == 0:
            # TODO(synk): rare fallback (S has no multiple-of-128 divisor <= cap):
            # zero-pad the sample axis (one HBM copy) instead of masking in-kernel.
            block_s = cap
            pad_s = _round_up(S, block_s) - S
        grid_s = (S + pad_s) // block_s
        assert block_s % 128 == 0

    # --- batch-axis tiling ----------------------------------------------------
    if bsz <= 128:
        block_b = bsz                                       # full-dim block, no OOB reads
    else:
        fixed = _bytes_needed(block_s, 0)
        per_row = max(1, _bytes_needed(block_s, 1) - fixed)
        avail = max(0, budget - fixed)
        bb = max(128, avail // per_row)
        bb = min(bb, 1024, _round_up(bsz, 128))
        if bsz >= 256:
            # keep >= 2 batch tiles so both v7x TensorCores get work
            bb = min(bb, _round_up(_cdiv(bsz, 2), 128))
        block_b = max(128, (bb // 128) * 128)
    grid_b = _cdiv(bsz, block_b)

    # --- only the rare sample-axis fallback pads inputs ------------------------
    if pad_s:
        spectra = jnp.pad(spectra, ((0, 0), (0, pad_s)))
        if trans_ndim == 2:
            trans = jnp.pad(trans, ((0, 0), (0, pad_s)))
        else:
            trans = jnp.pad(trans, ((0, 0), (0, 0), (0, pad_s)))

    # --- specs / kernel selection ----------------------------------------------
    if collapse:
        grid = (grid_b,)
        dims = ("parallel",)
        spectra_spec = pl.BlockSpec((block_b, block_s), lambda i: (i, 0))
        out_spec = pl.BlockSpec((nbands, block_b), lambda i: (0, i))
        if batch_indep:
            inv_spec = pl.BlockSpec((nbands, 1), lambda i: (0, 0))
        else:
            inv_spec = pl.BlockSpec((nbands, block_b), lambda i: (0, i))
        if trans_ndim == 2:
            trans_spec = pl.BlockSpec((nbands, block_s), lambda i: (0, 0))
            kernel = _dot2d_fast_kernel
        else:
            trans_spec = pl.BlockSpec((block_b, nbands, block_s), lambda i: (i, 0, 0))
            kernel = _dot3d_fast_kernel
        scratch = []
    else:
        grid = (grid_b, grid_s)
        dims = ("parallel", "arbitrary")
        spectra_spec = pl.BlockSpec((block_b, block_s), lambda i, s: (i, s))
        out_spec = pl.BlockSpec((nbands, block_b), lambda i, s: (0, i))
        if batch_indep:
            inv_spec = pl.BlockSpec((nbands, 1), lambda i, s: (0, 0))
        else:
            inv_spec = pl.BlockSpec((nbands, block_b), lambda i, s: (0, i))
        if trans_ndim == 2:
            trans_spec = pl.BlockSpec((nbands, block_s), lambda i, s: (0, s))
            kernel = _dot2d_reduce_kernel
            scratch = [pltpu.VMEM((nbands, block_b), jnp.float32)]
        else:
            trans_spec = pl.BlockSpec((block_b, nbands, block_s), lambda i, s: (i, 0, s))
            kernel = _dot3d_reduce_kernel
            scratch = [pltpu.VMEM((block_b, nbands, 128), jnp.float32)]

    out_t = pl.pallas_call(
        kernel,
        out_shape=jax.ShapeDtypeStruct((nbands, bsz), out_dtype),
        grid_spec=pltpu.PrefetchScalarGridSpec(
            num_scalar_prefetch=0,
            grid=grid,
            in_specs=[spectra_spec, trans_spec, inv_spec],
            out_specs=out_spec,
            scratch_shapes=scratch,
        ),
        compiler_params=pltpu.CompilerParams(
            dimension_semantics=dims,
            vmem_limit_bytes=vmem_limit,
        ),
        interpret=interpret,
    )(spectra, trans, inv_t)

    return out_t.T   # tiny [nbands, bsz] -> [bsz, nbands]


# --------------------------------------------------------------------------- #
# self-test
# --------------------------------------------------------------------------- #
if __name__ == "__main__":
    key = jax.random.PRNGKey(0)
    k1, k2, k3 = jax.random.split(key, 3)

    bsz, nbands, S = 8, 4, 256
    spectra = jax.random.normal(k1, (bsz, S), dtype=jnp.float32)
    trans2d = jax.random.uniform(k2, (nbands, S), dtype=jnp.float32)        # infer
    trans3d = jax.random.uniform(k3, (bsz, nbands, S), dtype=jnp.float32)   # train
    trans_mask = jnp.ones((nbands, S), dtype=jnp.float32)  # unused by dot_prod paths

    nsmpl_hdcd = jnp.array([float(S)], dtype=jnp.float32)                    # [1]
    nsmpl_band = jnp.linspace(S / 2.0, float(S), nbands, dtype=jnp.float32)  # [nbands]
    nsmpl_mix = jnp.linspace(S / 2.0, float(S), bsz * nbands,
                             dtype=jnp.float32).reshape(bsz, nbands)         # [bsz, nbands]
    nsmpl_pix = jnp.linspace(S / 2.0, float(S), bsz, dtype=jnp.float32)      # [bsz]

    # fast (single-S-tile) paths
    out_hdcd = hs_integrate(spectra, trans2d, trans_mask, nsmpl_hdcd)
    out_band = hs_integrate(spectra, trans2d, trans_mask, nsmpl_band)
    out_mix = hs_integrate(spectra, trans3d, None, nsmpl_mix)
    out_pix = hs_integrate(spectra, trans3d, None, nsmpl_pix)
    out_id = hs_integrate(spectra, trans2d, trans_mask, nsmpl_hdcd,
                          integration_method="identity")
    # ragged batch (partial batch tile, no input padding)
    out_rag = hs_integrate(spectra[:6], trans2d, trans_mask, nsmpl_hdcd)
    # forced reduction-grid paths (multi-step sample axis)
    out_r2d = hs_integrate(spectra, trans2d, trans_mask, nsmpl_hdcd,
                           single_s_tile=False, block_s_max=128)
    out_r3d = hs_integrate(spectra, trans3d, None, nsmpl_mix,
                           single_s_tile=False, block_s_max=128)
    # sample count with no multiple-of-128 divisor (exercises the pad fallback)
    S2 = 320
    spectra_b = jax.random.normal(k1, (bsz, S2), dtype=jnp.float32)
    trans2d_b = jax.random.uniform(k2, (nbands, S2), dtype=jnp.float32)
    out_pad = hs_integrate(spectra_b, trans2d_b, None, nsmpl_hdcd,
                           single_s_tile=False, block_s_max=128)

    jax.block_until_ready((out_hdcd, out_band, out_mix, out_pix, out_id,
                           out_rag, out_r2d, out_r3d, out_pad))

    ref2d = jnp.einsum("ij,lj->il", spectra, trans2d)
    ref3d = jnp.einsum("ij,ilj->il", spectra, trans3d)
    ref_hdcd = ref2d / nsmpl_hdcd
    ref_band = ref2d / nsmpl_band
    ref_mix = ref3d / nsmpl_mix
    ref_pix = ref3d / nsmpl_pix[:, None]
    ref_rag = jnp.einsum("ij,lj->il", spectra[:6], trans2d) / nsmpl_hdcd
    ref_pad = jnp.einsum("ij,lj->il", spectra_b, trans2d_b) / nsmpl_hdcd

    assert out_hdcd.shape == (bsz, nbands)
    assert out_mix.shape == (bsz, nbands)
    assert out_rag.shape == (6, nbands)
    ok = lambda a, b: jnp.allclose(a, b, rtol=1e-4, atol=1e-4)
    assert ok(out_hdcd, ref_hdcd)
    assert ok(out_band, ref_band)
    assert ok(out_mix, ref_mix)
    assert ok(out_pix, ref_pix)
    assert ok(out_rag, ref_rag)
    assert ok(out_r2d, ref_hdcd)
    assert ok(out_r3d, ref_mix)
    assert ok(out_pad, ref_pad)
    assert jnp.array_equal(out_id, spectra)

    print("KERNEL_OK")
</pallas_src>

<mosaic_0001>
module attributes {stable_mosaic.version = 11 : i64} {
  func.func @_dot2d_fast_kernel(%arg0: i32, %arg1: memref<8x256xf32, #tpu.memory_space<vmem>>, %arg2: memref<4x256xf32, #tpu.memory_space<vmem>>, %arg3: memref<4x1xf32, #tpu.memory_space<vmem>>, %arg4: memref<4x8xf32, #tpu.memory_space<vmem>>) attributes {dimension_semantics = [#tpu.dimension_semantics<parallel>], iteration_bounds = array<i64: 1>, scalar_prefetch = 0 : i64, scratch_operands = 0 : i64, tpu.core_type = #tpu.core_type<tc>, window_params = [{transform_indices = @transform_0, window_bounds = array<i64: 8, 256>}, {pipeline_mode = #tpu.pipeline_mode<synchronous>, transform_indices = @transform_1, window_bounds = array<i64: 4, 256>}, {pipeline_mode = #tpu.pipeline_mode<synchronous>, transform_indices = @transform_2, window_bounds = array<i64: 4, 1>}, {transform_indices = @transform_3, window_bounds = array<i64: 4, 8>}]} {
    %c0 = arith.constant 0 : index
    %c0_0 = arith.constant 0 : index
    %0 = vector.load %arg2[%c0, %c0_0] : memref<4x256xf32, #tpu.memory_space<vmem>>, vector<4x256xf32>
    %c0_1 = arith.constant 0 : index
    %c0_2 = arith.constant 0 : index
    %1 = vector.load %arg1[%c0_1, %c0_2] : memref<8x256xf32, #tpu.memory_space<vmem>>, vector<8x256xf32>
    %cst = arith.constant dense<0.000000e+00> : vector<4x8xf32>
    %2 = tpu.matmul %0, %1, %cst {dimension_numbers = #tpu.dot_dimension_numbers<[1], [1], [0], [0], [0, 0, 1, 0], [], []>} : vector<4x256xf32>, vector<8x256xf32>, vector<4x8xf32> -> vector<4x8xf32>
    %c0_3 = arith.constant 0 : index
    %c0_4 = arith.constant 0 : index
    %3 = vector.load %arg3[%c0_3, %c0_4] : memref<4x1xf32, #tpu.memory_space<vmem>>, vector<4x1xf32>
    %4 = vector.broadcast %3 : vector<4x1xf32> to vector<4x8xf32>
    %5 = arith.mulf %2, %4 : vector<4x8xf32>
    %c0_5 = arith.constant 0 : index
    %c0_6 = arith.constant 0 : index
    %6 = vector.load %arg4[%c0_5, %c0_6] : memref<4x8xf32, #tpu.memory_space<vmem>>, vector<4x8xf32>
    tpu.vector_store %arg4[%c0_5, %c0_6], %5 {strides = array<i32>} : memref<4x8xf32, #tpu.memory_space<vmem>>, vector<4x8xf32>,
    return
  }
  func.func @transform_0(%arg0: i32) -> (i32, i32) {
    %c0_i32 = arith.constant 0 : i32
    %c0_i32_0 = arith.constant 0 : i32
    return %arg0, %c0_i32 : i32, i32
  }
  func.func @transform_1(%arg0: i32) -> (i32, i32) {
    %c0_i32 = arith.constant 0 : i32
    %c0_i32_0 = arith.constant 0 : i32
    %c0_i32_1 = arith.constant 0 : i32
    return %c0_i32, %c0_i32_0 : i32, i32
  }
  func.func @transform_2(%arg0: i32) -> (i32, i32) {
    %c0_i32 = arith.constant 0 : i32
    %c0_i32_0 = arith.constant 0 : i32
    %c0_i32_1 = arith.constant 0 : i32
    return %c0_i32, %c0_i32_0 : i32, i32
  }
  func.func @transform_3(%arg0: i32) -> (i32, i32) {
    %c0_i32 = arith.constant 0 : i32
    %c0_i32_0 = arith.constant 0 : i32
    return %c0_i32, %arg0 : i32, i32
  }
}

</mosaic_0001>

<bundles_post_ra>
// kernel: tpu_custom_call.1
= control target key start
LH: loop header
LB: loop body
LE: loop exit
PB: predicated region body
PF: predicated region fallthrough
CT: control target
= control target key end

     0   :  { %8 = vsyncpa [#allocation3], 0  ;;  %s238_s0 = inlined_call_operand.hbm [shape: f32[8,256], index: 0, kind: input, shape index: {}]   ;;  %s239_s1 = inlined_call_operand.hbm [shape: f32[4,256], index: 1, kind: input, shape index: {}]   ;;  %s240_s2 = inlined_call_operand.vmem [shape: f32[4,1], index: 2, kind: input, shape index: {}]   ;;  %s241_s3 = inlined_call_operand.hbm [shape: f32[4,8], index: 3, kind: output, shape index: {}]  }
   0x1   :  { %9 = vsyncpa [#allocation6], 0 }
   0x2   :  { %10 = vsyncpa [#allocation4], 0  ;;  %s16_s14 = sshll.u32 %s238_s0, 4  ;;  %s202_s15 = smov [#allocation2]   ;;  %s17_s14 = int_to_ptr.hbm [resolvable:$true] %s16_s14 }
   0x3   :  { %s18_s16 = sshll.u32 %s202_s15, 4  ;;  %s27_s19 = sshll.u32 %s239_s1, 4  ;;  %s19_s16 = int_to_ptr.vmem [resolvable:$true] %s18_s16  ;;  %s28_s19 = int_to_ptr.hbm [resolvable:$true] %s27_s19 }
   0x4   :  { %21 = dma.hbm_to_vmem [thread:$0]  %s17_s14, 256, %s19_s16, [#allocation3]  }
   0x5   :  { %s203_s20 = smov [#allocation5]  }
   0x6   :  { %s29_s21 = sshll.u32 %s203_s20, 4  ;;  %s30_s21 = int_to_ptr.vmem [resolvable:$true] %s29_s21 }
   0x7   :  { %32 = dma.hbm_to_vmem [thread:$0]  %s28_s19, 128, %s30_s21, [#allocation6]  }
   0x8   :  { %196 = dma.done.wait [#allocation3], 256  }
   0x9   :  { %197 = vsyncadd [#allocation3], 4294967040 }
   0xa   :  { %198 = dma.done.wait [#allocation6], 128  }
   0xb   :  { %199 = vsyncadd [#allocation6], 4294967168  ;;  %v204_v0 = vmov 0   ;;  %v43_v1 = vld [vmem:[#allocation5] sm:$0xff]  ;;  %v44_v2 = vld [vmem:[#allocation2] sm:$0xff]  ;;  %s205_s22 = smov [#allocation7]  }
   0xc   :  { %123 = vset.pattern.permute.xlu0 %v204_v0  ;;  %v45_v3 = vld [vmem:[#allocation2 + $0x8] sm:$0xff]  ;;  %47 = vst [vmem:[#allocation1] ss:$2 sm:$0xff] %v43_v1  ;;  %67 = vmatpush.xpose.msra.mxu0 %v44_v2  ;;  %v92_v4 = vld [vmem:[%s240_s2] sm:$0xf]  ;;  %s106_s23 = sshll.u32 %s205_s22, 4  ;;  %s107_s23 = int_to_ptr.vmem [resolvable:$true] %s106_s23 }
   0xd   :  { %87 = vmatpush.xpose.msra.mxu1 %v45_v3  ;;  %95 = vperm.xlu0 %123, %v92_v4   ;;  %s108_s26 = sshll.u32 %s241_s3, 4  ;;  %vm99_vm0 = vcmask 60416   ;;  %s109_s26 = int_to_ptr.hbm [resolvable:$true] %s108_s26 }
  0x13   :  { %v48_v5 = vld.sshfl [vmem:[#allocation1] sm:$0xff pattern:$0x75316420]  ;;  %v49_v6 = vld.sshfl [vmem:[#allocation1 + $0x8] sm:$0xff pattern:$0x75316420] }
  0x14   :  { %68 = vmatmul.f32.vlgmr.msra.gmra.mxu0 %v48_v5  ;;  %88 = vmatmul.f32.vlgmr.msra.gmra.mxu1 %v49_v6 }
  0x7f   :  { %v96_v7 = vpop.permute.xlu0 %95 }
  0x91   :  { %v69_v8 = vpop.f32.mrf.mxu0  ;;  %v89_v9 = vpop.f32.mrf.mxu1 }
  0x92   :  { %v90_v10 = vadd.f32 %v89_v9, %v69_v8 }
  0x94   :  { %v98_v11 = vmul.f32 %v96_v7, %v90_v10 }
  0x96   :  { %100 = vst.msk [vmem:[#allocation7] sm:$0xf] %vm99_vm0, %v98_v11 }
  0x97   :  { %111 = dma.vmem_to_hbm [thread:$0]  %s107_s23, 64, %s109_s26, [#allocation4]  }
  0x98   :  { %200 = dma.done.wait [#allocation4], 64  }
  0x99   :  { %201 = vsyncadd [#allocation4], 4294967232 }
  0x9a   :  { %116 = vsyncpa [#allocation3], 1 }
  0x9b   :  { %117 = vsyncpa [#allocation6], 1 }
  0x9c   :  { %118 = vsyncpa [#allocation4], 1 }

</bundles_post_ra>
